<compile_context>
chip_gen: v7x
topology: tpu7x:2x2x1
jax: 0.10.0
libtpu: 0.0.40
codegen_flags: <defaults>
</compile_context>

<pallas_src>
import math
import jax
import jax.numpy as jnp
from jax import lax
from jax.experimental import pallas as pl
from jax.experimental.pallas import tpu as pltpu

# ----- synthetic CLIP-ViT config (small, deterministic) -----
IMG = 16                      # config.image_size
PATCH = 8                     # config.patch_size
CHANS = 3                     # RGB
HIDDEN = 32                   # config.hidden_size
HEADS = 2
HEAD_DIM = HIDDEN // HEADS
FFN = 64                      # intermediate_size
LAYERS = 2
GRID_SIDE = IMG // PATCH      # num_patches_per_side
NUM_PATCHES = GRID_SIDE * GRID_SIDE
SEQ = NUM_PATCHES + 1         # +1 CLS token
PATCH_DIM = CHANS * PATCH * PATCH
SELECT_LAYER = -2             # args.mm_vision_select_layer
SELECT_FEATURE = "patch"      # drop CLS token
LN_EPS = 1e-5

# hidden_states[i] is the activation after i encoder layers (index 0 = post
# pre-LN embedding).  Only N_RUN layers are needed for the selected feature.
_N_HIDDEN = LAYERS + 1
_SEL_IDX = SELECT_LAYER if SELECT_LAYER >= 0 else _N_HIDDEN + SELECT_LAYER
N_RUN = _SEL_IDX


def _ln(x, g, b):
    mean = jnp.mean(x, axis=-1, keepdims=True)
    xc = x - mean
    var = jnp.mean(xc * xc, axis=-1, keepdims=True)
    return xc * lax.rsqrt(var + LN_EPS) * g + b


# ---------------------------------------------------------------------------
# Fused tower kernel: one grid step == one image, everything VMEM resident.
# ---------------------------------------------------------------------------
def _tower_kernel(p_ref, pw_ref, eb_ref, lpg_ref, lpb_ref,
                  ln1g_ref, ln1b_ref, wq_ref, bq_ref, wk_ref, bk_ref,
                  wv_ref, bv_ref, wo_ref, bo_ref, ln2g_ref, ln2b_ref,
                  w1_ref, b1_ref, w2_ref, b2_ref, o_ref):
    # ---- embeddings: row 0 of p_ref is zero (CLS slot), emb_bias row 0 holds
    #      cls + pos[0]; rows 1.. hold pos[1:].  One matmul does all SEQ rows.
    x = jnp.dot(p_ref[...], pw_ref[...],
                preferred_element_type=jnp.float32) + eb_ref[...]      # (SEQ, D)
    x = _ln(x, lpg_ref[...], lpb_ref[...])          # hidden_states[0]

    scale = 1.0 / math.sqrt(HEAD_DIM)
    for l in range(N_RUN):                          # static unroll over layers
        # -- multi-head self attention
        h = _ln(x, ln1g_ref[l], ln1b_ref[l])
        attn = jnp.zeros_like(x)
        for hd in range(HEADS):                     # static unroll over heads
            qh = (jnp.dot(h, wq_ref[l, hd], preferred_element_type=jnp.float32)
                  + bq_ref[l, hd]) * scale                              # (S, Dh)
            kh = jnp.dot(h, wk_ref[l, hd],
                         preferred_element_type=jnp.float32) + bk_ref[l, hd]
            vh = jnp.dot(h, wv_ref[l, hd],
                         preferred_element_type=jnp.float32) + bv_ref[l, hd]
            s = lax.dot_general(qh, kh, (((1,), (1,)), ((), ())),
                                preferred_element_type=jnp.float32)     # (S, S)
            m = jnp.max(s, axis=-1, keepdims=True)
            e = jnp.exp(s - m)
            inv = pl.reciprocal(jnp.sum(e, axis=-1, keepdims=True), approx=True)
            p = e * inv
            ch = jnp.dot(p, vh, preferred_element_type=jnp.float32)     # (S, Dh)
            attn = attn + jnp.dot(ch, wo_ref[l, hd],
                                  preferred_element_type=jnp.float32)
        x = x + attn + bo_ref[l]                    # attention residual

        # -- MLP with quick_gelu (CLIP)
        h2 = _ln(x, ln2g_ref[l], ln2b_ref[l])
        f = jnp.dot(h2, w1_ref[l], preferred_element_type=jnp.float32) + b1_ref[l]
        f = f * jax.nn.sigmoid(1.702 * f)
        x = x + jnp.dot(f, w2_ref[l], preferred_element_type=jnp.float32) + b2_ref[l]

    o_ref[...] = x                                  # hidden_states[SELECT_LAYER]


# ---------------------------------------------------------------------------
# CLIPVisionTower.forward equivalent
# ---------------------------------------------------------------------------
def clip_vision_tower_forward(images, params):
    """images: [B, C, H, W] float32 (NCHW, same as the PyTorch module)."""
    orig_dtype = images.dtype
    B = images.shape[0]
    images = images.astype(jnp.float32)

    # im2col of non-overlapping patches, flattened in (c, i, j) order -> the
    # stride==kernel Conv2d becomes a plain matmul (no bias in CLIP patch conv).
    patches = images.reshape(B, CHANS, GRID_SIDE, PATCH, GRID_SIDE, PATCH)
    patches = patches.transpose(0, 2, 4, 1, 3, 5).reshape(B, NUM_PATCHES, PATCH_DIM)
    # prepend a zero "CLS row" so the embedding matmul produces all SEQ rows.
    patches_ext = jnp.pad(patches, ((0, 0), (1, 0), (0, 0)))            # (B, SEQ, K)
    # embedding bias: row 0 = cls + pos[0], rows 1.. = pos[1:]  (tiny param prep)
    emb_bias = jnp.concatenate(
        [params["cls"] + params["pos"][:1], params["pos"][1:]], axis=0)  # (SEQ, D)

    nl = max(N_RUN, 1)   # slice stacked weights to the layers actually run
    ws = (params["patch_w"], emb_bias, params["ln_pre_g"], params["ln_pre_b"],
          params["ln1_g"][:nl], params["ln1_b"][:nl],
          params["wq"][:nl], params["bq"][:nl],
          params["wk"][:nl], params["bk"][:nl],
          params["wv"][:nl], params["bv"][:nl],
          params["wo"][:nl], params["bo"][:nl],
          params["ln2_g"][:nl], params["ln2_b"][:nl],
          params["w1"][:nl], params["b1"][:nl],
          params["w2"][:nl], params["b2"][:nl])

    def _full(a):
        nd = a.ndim
        return pl.BlockSpec(a.shape, lambda b, _nd=nd: (0,) * _nd)

    hidden_sel = pl.pallas_call(
        _tower_kernel,
        out_shape=jax.ShapeDtypeStruct((B, SEQ, HIDDEN), jnp.float32),
        grid=(B,),
        in_specs=[pl.BlockSpec((pl.Squeezed(), SEQ, PATCH_DIM),
                               lambda b: (b, 0, 0))]
                 + [_full(w) for w in ws],
        out_specs=pl.BlockSpec((pl.Squeezed(), SEQ, HIDDEN),
                               lambda b: (b, 0, 0)),
        compiler_params=pltpu.CompilerParams(
            dimension_semantics=("parallel",)),
    )(patches_ext, *ws)

    # feature_select(...)
    if SELECT_FEATURE == "patch":
        feats = hidden_sel[:, 1:]          # drop CLS token
    else:                                  # 'cls_patch'
        feats = hidden_sel
    return feats.astype(orig_dtype)


# ---------------------------------------------------------------------------
# pure-JAX reference (same math, runs all layers like the HF model would)
# ---------------------------------------------------------------------------
def _ref_forward(images, params):
    B = images.shape[0]
    patches = images.reshape(B, CHANS, GRID_SIDE, PATCH, GRID_SIDE, PATCH)
    patches = patches.transpose(0, 2, 4, 1, 3, 5).reshape(B, NUM_PATCHES, PATCH_DIM)
    pe = jnp.einsum("bnk,kd->bnd", patches, params["patch_w"])
    cls = jnp.broadcast_to(params["cls"][None], (B, 1, HIDDEN))
    x = jnp.concatenate([cls, pe], axis=1) + params["pos"][None]
    x = _ln(x, params["ln_pre_g"], params["ln_pre_b"])
    hidden = [x]
    scale = 1.0 / math.sqrt(HEAD_DIM)
    for l in range(LAYERS):
        h = _ln(x, params["ln1_g"][l], params["ln1_b"][l])
        acc = jnp.zeros_like(x)
        for hd in range(HEADS):
            qh = (jnp.einsum("bsd,de->bse", h, params["wq"][l, hd])
                  + params["bq"][l, hd]) * scale
            kh = jnp.einsum("bsd,de->bse", h, params["wk"][l, hd]) + params["bk"][l, hd]
            vh = jnp.einsum("bsd,de->bse", h, params["wv"][l, hd]) + params["bv"][l, hd]
            s = jnp.einsum("bse,bte->bst", qh, kh)
            p = jax.nn.softmax(s, axis=-1)
            ch = jnp.einsum("bst,bte->bse", p, vh)
            acc = acc + jnp.einsum("bse,ed->bsd", ch, params["wo"][l, hd])
        x = x + acc + params["bo"][l]
        h2 = _ln(x, params["ln2_g"][l], params["ln2_b"][l])
        f = jnp.einsum("bsd,df->bsf", h2, params["w1"][l]) + params["b1"][l]
        f = f * jax.nn.sigmoid(1.702 * f)
        x = x + jnp.einsum("bsf,fd->bsd", f, params["w2"][l]) + params["b2"][l]
        hidden.append(x)
    feats = hidden[SELECT_LAYER]
    if SELECT_FEATURE == "patch":
        feats = feats[:, 1:]
    return feats


# ---------------------------------------------------------------------------
# deterministic synthetic parameters (per-layer weights stacked on axis 0)
# ---------------------------------------------------------------------------
def make_params(key):
    ks = iter(jax.random.split(key, 16))

    def nrm(shape):
        return 0.02 * jax.random.normal(next(ks), shape, jnp.float32)

    return {
        "patch_w": nrm((PATCH_DIM, HIDDEN)),
        "cls": nrm((1, HIDDEN)),
        "pos": nrm((SEQ, HIDDEN)),
        "ln_pre_g": jnp.ones((1, HIDDEN), jnp.float32),
        "ln_pre_b": jnp.zeros((1, HIDDEN), jnp.float32),
        "ln1_g": jnp.ones((LAYERS, 1, HIDDEN), jnp.float32),
        "ln1_b": jnp.zeros((LAYERS, 1, HIDDEN), jnp.float32),
        "wq": nrm((LAYERS, HEADS, HIDDEN, HEAD_DIM)),
        "bq": nrm((LAYERS, HEADS, 1, HEAD_DIM)),
        "wk": nrm((LAYERS, HEADS, HIDDEN, HEAD_DIM)),
        "bk": nrm((LAYERS, HEADS, 1, HEAD_DIM)),
        "wv": nrm((LAYERS, HEADS, HIDDEN, HEAD_DIM)),
        "bv": nrm((LAYERS, HEADS, 1, HEAD_DIM)),
        "wo": nrm((LAYERS, HEADS, HEAD_DIM, HIDDEN)),
        "bo": nrm((LAYERS, 1, HIDDEN)),
        "ln2_g": jnp.ones((LAYERS, 1, HIDDEN), jnp.float32),
        "ln2_b": jnp.zeros((LAYERS, 1, HIDDEN), jnp.float32),
        "w1": nrm((LAYERS, HIDDEN, FFN)),
        "b1": nrm((LAYERS, 1, FFN)),
        "w2": nrm((LAYERS, FFN, HIDDEN)),
        "b2": nrm((LAYERS, 1, HIDDEN)),
    }


if __name__ == "__main__":
    key = jax.random.PRNGKey(0)
    k_img, k_par = jax.random.split(key)
    images = jax.random.normal(k_img, (2, CHANS, IMG, IMG), jnp.float32)  # NCHW
    params = make_params(k_par)

    feats = jax.block_until_ready(clip_vision_tower_forward(images, params))
    assert feats.shape == (2, NUM_PATCHES, HIDDEN), feats.shape

    ref = jax.block_until_ready(_ref_forward(images, params))
    max_err = float(jnp.max(jnp.abs(feats - ref)))
    assert jnp.allclose(feats, ref, rtol=2e-3, atol=2e-3), max_err

    print("KERNEL_OK")
</pallas_src>

<mosaic_0001>
module attributes {stable_mosaic.version = 11 : i64} {
  func.func @_tower_kernel(%arg0: i32, %arg1: memref<1x5x192xf32, #tpu.memory_space<vmem>>, %arg2: memref<192x32xf32, #tpu.memory_space<vmem>>, %arg3: memref<5x32xf32, #tpu.memory_space<vmem>>, %arg4: memref<1x32xf32, #tpu.memory_space<vmem>>, %arg5: memref<1x32xf32, #tpu.memory_space<vmem>>, %arg6: memref<1x1x32xf32, #tpu.memory_space<vmem>>, %arg7: memref<1x1x32xf32, #tpu.memory_space<vmem>>, %arg8: memref<1x2x32x16xf32, #tpu.memory_space<vmem>>, %arg9: memref<1x2x1x16xf32, #tpu.memory_space<vmem>>, %arg10: memref<1x2x32x16xf32, #tpu.memory_space<vmem>>, %arg11: memref<1x2x1x16xf32, #tpu.memory_space<vmem>>, %arg12: memref<1x2x32x16xf32, #tpu.memory_space<vmem>>, %arg13: memref<1x2x1x16xf32, #tpu.memory_space<vmem>>, %arg14: memref<1x2x16x32xf32, #tpu.memory_space<vmem>>, %arg15: memref<1x1x32xf32, #tpu.memory_space<vmem>>, %arg16: memref<1x1x32xf32, #tpu.memory_space<vmem>>, %arg17: memref<1x1x32xf32, #tpu.memory_space<vmem>>, %arg18: memref<1x32x64xf32, #tpu.memory_space<vmem>>, %arg19: memref<1x1x64xf32, #tpu.memory_space<vmem>>, %arg20: memref<1x64x32xf32, #tpu.memory_space<vmem>>, %arg21: memref<1x1x32xf32, #tpu.memory_space<vmem>>, %arg22: memref<1x5x32xf32, #tpu.memory_space<vmem>>) attributes {dimension_semantics = [#tpu.dimension_semantics<parallel>], iteration_bounds = array<i64: 2>, scalar_prefetch = 0 : i64, scratch_operands = 0 : i64, tpu.core_type = #tpu.core_type<tc>, window_params = [{transform_indices = @transform_0, window_bounds = array<i64: 1, 5, 192>}, {pipeline_mode = #tpu.pipeline_mode<synchronous>, transform_indices = @transform_1, window_bounds = array<i64: 192, 32>}, {pipeline_mode = #tpu.pipeline_mode<synchronous>, transform_indices = @transform_2, window_bounds = array<i64: 5, 32>}, {pipeline_mode = #tpu.pipeline_mode<synchronous>, transform_indices = @transform_3, window_bounds = array<i64: 1, 32>}, {pipeline_mode = #tpu.pipeline_mode<synchronous>, transform_indices = @transform_4, window_bounds = array<i64: 1, 32>}, {pipeline_mode = #tpu.pipeline_mode<synchronous>, transform_indices = @transform_5, window_bounds = array<i64: 1, 1, 32>}, {pipeline_mode = #tpu.pipeline_mode<synchronous>, transform_indices = @transform_6, window_bounds = array<i64: 1, 1, 32>}, {pipeline_mode = #tpu.pipeline_mode<synchronous>, transform_indices = @transform_7, window_bounds = array<i64: 1, 2, 32, 16>}, {pipeline_mode = #tpu.pipeline_mode<synchronous>, transform_indices = @transform_8, window_bounds = array<i64: 1, 2, 1, 16>}, {pipeline_mode = #tpu.pipeline_mode<synchronous>, transform_indices = @transform_9, window_bounds = array<i64: 1, 2, 32, 16>}, {pipeline_mode = #tpu.pipeline_mode<synchronous>, transform_indices = @transform_10, window_bounds = array<i64: 1, 2, 1, 16>}, {pipeline_mode = #tpu.pipeline_mode<synchronous>, transform_indices = @transform_11, window_bounds = array<i64: 1, 2, 32, 16>}, {pipeline_mode = #tpu.pipeline_mode<synchronous>, transform_indices = @transform_12, window_bounds = array<i64: 1, 2, 1, 16>}, {pipeline_mode = #tpu.pipeline_mode<synchronous>, transform_indices = @transform_13, window_bounds = array<i64: 1, 2, 16, 32>}, {pipeline_mode = #tpu.pipeline_mode<synchronous>, transform_indices = @transform_14, window_bounds = array<i64: 1, 1, 32>}, {pipeline_mode = #tpu.pipeline_mode<synchronous>, transform_indices = @transform_15, window_bounds = array<i64: 1, 1, 32>}, {pipeline_mode = #tpu.pipeline_mode<synchronous>, transform_indices = @transform_16, window_bounds = array<i64: 1, 1, 32>}, {pipeline_mode = #tpu.pipeline_mode<synchronous>, transform_indices = @transform_17, window_bounds = array<i64: 1, 32, 64>}, {pipeline_mode = #tpu.pipeline_mode<synchronous>, transform_indices = @transform_18, window_bounds = array<i64: 1, 1, 64>}, {pipeline_mode = #tpu.pipeline_mode<synchronous>, transform_indices = @transform_19, window_bounds = array<i64: 1, 64, 32>}, {pipeline_mode = #tpu.pipeline_mode<synchronous>, transform_indices = @transform_20, window_bounds = array<i64: 1, 1, 32>}, {transform_indices = @transform_21, window_bounds = array<i64: 1, 5, 32>}]} {
    %c0 = arith.constant 0 : index
    %c0_0 = arith.constant 0 : index
    %c0_1 = arith.constant 0 : index
    %0 = vector.load %arg1[%c0, %c0_0, %c0_1] : memref<1x5x192xf32, #tpu.memory_space<vmem>>, vector<1x5x192xf32>
    %1 = vector.shape_cast %0 : vector<1x5x192xf32> to vector<5x192xf32>
    %c0_2 = arith.constant 0 : index
    %c0_3 = arith.constant 0 : index
    %2 = vector.load %arg2[%c0_2, %c0_3] : memref<192x32xf32, #tpu.memory_space<vmem>>, vector<192x32xf32>
    %cst = arith.constant dense<0.000000e+00> : vector<5x32xf32>
    %3 = tpu.matmul %1, %2, %cst {dimension_numbers = #tpu.dot_dimension_numbers<[1], [0], [0], [1], [0, 0, 1, 1], [], []>} : vector<5x192xf32>, vector<192x32xf32>, vector<5x32xf32> -> vector<5x32xf32>
    %c0_4 = arith.constant 0 : index
    %c0_5 = arith.constant 0 : index
    %4 = vector.load %arg3[%c0_4, %c0_5] : memref<5x32xf32, #tpu.memory_space<vmem>>, vector<5x32xf32>
    %5 = arith.addf %3, %4 : vector<5x32xf32>
    %c0_6 = arith.constant 0 : index
    %c0_7 = arith.constant 0 : index
    %6 = vector.load %arg4[%c0_6, %c0_7] : memref<1x32xf32, #tpu.memory_space<vmem>>, vector<1x32xf32>
    %c0_8 = arith.constant 0 : index
    %c0_9 = arith.constant 0 : index
    %7 = vector.load %arg5[%c0_8, %c0_9] : memref<1x32xf32, #tpu.memory_space<vmem>>, vector<1x32xf32>
    %cst_10 = arith.constant dense<0.000000e+00> : vector<5xf32>
    %8 = vector.multi_reduction <add>, %5, %cst_10 [1] : vector<5x32xf32> to vector<5xf32>
    %9 = vector.shape_cast %8 : vector<5xf32> to vector<5x1xf32>
    %cst_11 = arith.constant 3.200000e+01 : f32
    %10 = vector.broadcast %cst_11 : f32 to vector<5x1xf32>
    %11 = arith.divf %9, %10 : vector<5x1xf32>
    %12 = vector.broadcast %11 : vector<5x1xf32> to vector<5x32xf32>
    %13 = arith.subf %5, %12 : vector<5x32xf32>
    %14 = arith.mulf %13, %13 : vector<5x32xf32>
    %cst_12 = arith.constant dense<0.000000e+00> : vector<5xf32>
    %15 = vector.multi_reduction <add>, %14, %cst_12 [1] : vector<5x32xf32> to vector<5xf32>
    %16 = vector.shape_cast %15 : vector<5xf32> to vector<5x1xf32>
    %cst_13 = arith.constant 3.200000e+01 : f32
    %17 = vector.broadcast %cst_13 : f32 to vector<5x1xf32>
    %18 = arith.divf %16, %17 : vector<5x1xf32>
    %cst_14 = arith.constant 9.99999974E-6 : f32
    %19 = vector.broadcast %cst_14 : f32 to vector<5x1xf32>
    %20 = arith.addf %18, %19 : vector<5x1xf32>
    %21 = math.rsqrt %20 : vector<5x1xf32>
    %22 = vector.broadcast %21 : vector<5x1xf32> to vector<5x32xf32>
    %23 = arith.mulf %13, %22 : vector<5x32xf32>
    %24 = vector.broadcast %6 : vector<1x32xf32> to vector<5x32xf32>
    %25 = arith.mulf %23, %24 : vector<5x32xf32>
    %26 = vector.broadcast %7 : vector<1x32xf32> to vector<5x32xf32>
    %27 = arith.addf %25, %26 : vector<5x32xf32>
    %c0_15 = arith.constant 0 : index
    %c0_16 = arith.constant 0 : index
    %c0_17 = arith.constant 0 : index
    %28 = vector.load %arg6[%c0_15, %c0_16, %c0_17] : memref<1x1x32xf32, #tpu.memory_space<vmem>>, vector<1x1x32xf32>
    %29 = vector.shape_cast %28 : vector<1x1x32xf32> to vector<1x32xf32>
    %c0_18 = arith.constant 0 : index
    %c0_19 = arith.constant 0 : index
    %c0_20 = arith.constant 0 : index
    %30 = vector.load %arg7[%c0_18, %c0_19, %c0_20] : memref<1x1x32xf32, #tpu.memory_space<vmem>>, vector<1x1x32xf32>
    %31 = vector.shape_cast %30 : vector<1x1x32xf32> to vector<1x32xf32>
    %cst_21 = arith.constant dense<0.000000e+00> : vector<5xf32>
    %32 = vector.multi_reduction <add>, %27, %cst_21 [1] : vector<5x32xf32> to vector<5xf32>
    %33 = vector.shape_cast %32 : vector<5xf32> to vector<5x1xf32>
    %cst_22 = arith.constant 3.200000e+01 : f32
    %34 = vector.broadcast %cst_22 : f32 to vector<5x1xf32>
    %35 = arith.divf %33, %34 : vector<5x1xf32>
    %36 = vector.broadcast %35 : vector<5x1xf32> to vector<5x32xf32>
    %37 = arith.subf %27, %36 : vector<5x32xf32>
    %38 = arith.mulf %37, %37 : vector<5x32xf32>
    %cst_23 = arith.constant dense<0.000000e+00> : vector<5xf32>
    %39 = vector.multi_reduction <add>, %38, %cst_23 [1] : vector<5x32xf32> to vector<5xf32>
    %40 = vector.shape_cast %39 : vector<5xf32> to vector<5x1xf32>
    %cst_24 = arith.constant 3.200000e+01 : f32
    %41 = vector.broadcast %cst_24 : f32 to vector<5x1xf32>
    %42 = arith.divf %40, %41 : vector<5x1xf32>
    %cst_25 = arith.constant 9.99999974E-6 : f32
    %43 = vector.broadcast %cst_25 : f32 to vector<5x1xf32>
    %44 = arith.addf %42, %43 : vector<5x1xf32>
    %45 = math.rsqrt %44 : vector<5x1xf32>
    %46 = vector.broadcast %45 : vector<5x1xf32> to vector<5x32xf32>
    %47 = arith.mulf %37, %46 : vector<5x32xf32>
    %48 = vector.broadcast %29 : vector<1x32xf32> to vector<5x32xf32>
    %49 = arith.mulf %47, %48 : vector<5x32xf32>
    %50 = vector.broadcast %31 : vector<1x32xf32> to vector<5x32xf32>
    %51 = arith.addf %49, %50 : vector<5x32xf32>
    %cst_26 = arith.constant 0.000000e+00 : f32
    %52 = vector.broadcast %cst_26 : f32 to vector<5x32xf32>
    %c0_27 = arith.constant 0 : index
    %c0_28 = arith.constant 0 : index
    %c0_29 = arith.constant 0 : index
    %c0_30 = arith.constant 0 : index
    %53 = vector.load %arg8[%c0_27, %c0_28, %c0_29, %c0_30] : memref<1x2x32x16xf32, #tpu.memory_space<vmem>>, vector<1x1x32x16xf32>
    %54 = vector.shape_cast %53 : vector<1x1x32x16xf32> to vector<32x16xf32>
    %cst_31 = arith.constant dense<0.000000e+00> : vector<5x16xf32>
    %55 = tpu.matmul %51, %54, %cst_31 {dimension_numbers = #tpu.dot_dimension_numbers<[1], [0], [0], [1], [0, 0, 1, 1], [], []>} : vector<5x32xf32>, vector<32x16xf32>, vector<5x16xf32> -> vector<5x16xf32>
    %c0_32 = arith.constant 0 : index
    %c0_33 = arith.constant 0 : index
    %c0_34 = arith.constant 0 : index
    %c0_35 = arith.constant 0 : index
    %56 = vector.load %arg9[%c0_32, %c0_33, %c0_34, %c0_35] : memref<1x2x1x16xf32, #tpu.memory_space<vmem>>, vector<1x1x1x16xf32>
    %57 = vector.shape_cast %56 : vector<1x1x1x16xf32> to vector<1x16xf32>
    %58 = vector.broadcast %57 : vector<1x16xf32> to vector<5x16xf32>
    %59 = arith.addf %55, %58 : vector<5x16xf32>
    %cst_36 = arith.constant 2.500000e-01 : f32
    %60 = vector.broadcast %cst_36 : f32 to vector<5x16xf32>
    %61 = arith.mulf %59, %60 : vector<5x16xf32>
    %c0_37 = arith.constant 0 : index
    %c0_38 = arith.constant 0 : index
    %c0_39 = arith.constant 0 : index
    %c0_40 = arith.constant 0 : index
    %62 = vector.load %arg10[%c0_37, %c0_38, %c0_39, %c0_40] : memref<1x2x32x16xf32, #tpu.memory_space<vmem>>, vector<1x1x32x16xf32>
    %63 = vector.shape_cast %62 : vector<1x1x32x16xf32> to vector<32x16xf32>
    %cst_41 = arith.constant dense<0.000000e+00> : vector<5x16xf32>
    %64 = tpu.matmul %51, %63, %cst_41 {dimension_numbers = #tpu.dot_dimension_numbers<[1], [0], [0], [1], [0, 0, 1, 1], [], []>} : vector<5x32xf32>, vector<32x16xf32>, vector<5x16xf32> -> vector<5x16xf32>
    %c0_42 = arith.constant 0 : index
    %c0_43 = arith.constant 0 : index
    %c0_44 = arith.constant 0 : index
    %c0_45 = arith.constant 0 : index
    %65 = vector.load %arg11[%c0_42, %c0_43, %c0_44, %c0_45] : memref<1x2x1x16xf32, #tpu.memory_space<vmem>>, vector<1x1x1x16xf32>
    %66 = vector.shape_cast %65 : vector<1x1x1x16xf32> to vector<1x16xf32>
    %67 = vector.broadcast %66 : vector<1x16xf32> to vector<5x16xf32>
    %68 = arith.addf %64, %67 : vector<5x16xf32>
    %c0_46 = arith.constant 0 : index
    %c0_47 = arith.constant 0 : index
    %c0_48 = arith.constant 0 : index
    %c0_49 = arith.constant 0 : index
    %69 = vector.load %arg12[%c0_46, %c0_47, %c0_48, %c0_49] : memref<1x2x32x16xf32, #tpu.memory_space<vmem>>, vector<1x1x32x16xf32>
    %70 = vector.shape_cast %69 : vector<1x1x32x16xf32> to vector<32x16xf32>
    %cst_50 = arith.constant dense<0.000000e+00> : vector<5x16xf32>
    %71 = tpu.matmul %51, %70, %cst_50 {dimension_numbers = #tpu.dot_dimension_numbers<[1], [0], [0], [1], [0, 0, 1, 1], [], []>} : vector<5x32xf32>, vector<32x16xf32>, vector<5x16xf32> -> vector<5x16xf32>
    %c0_51 = arith.constant 0 : index
    %c0_52 = arith.constant 0 : index
    %c0_53 = arith.constant 0 : index
    %c0_54 = arith.constant 0 : index
    %72 = vector.load %arg13[%c0_51, %c0_52, %c0_53, %c0_54] : memref<1x2x1x16xf32, #tpu.memory_space<vmem>>, vector<1x1x1x16xf32>
    %73 = vector.shape_cast %72 : vector<1x1x1x16xf32> to vector<1x16xf32>
    %74 = vector.broadcast %73 : vector<1x16xf32> to vector<5x16xf32>
    %75 = arith.addf %71, %74 : vector<5x16xf32>
    %cst_55 = arith.constant dense<0.000000e+00> : vector<5x5xf32>
    %76 = tpu.matmul %61, %68, %cst_55 {dimension_numbers = #tpu.dot_dimension_numbers<[1], [1], [0], [0], [0, 0, 1, 0], [], []>} : vector<5x16xf32>, vector<5x16xf32>, vector<5x5xf32> -> vector<5x5xf32>
    %cst_56 = arith.constant dense<0xFF800000> : vector<5xf32>
    %77 = vector.multi_reduction <maximumf>, %76, %cst_56 [1] : vector<5x5xf32> to vector<5xf32>
    %78 = vector.shape_cast %77 : vector<5xf32> to vector<5x1xf32>
    %79 = vector.broadcast %78 : vector<5x1xf32> to vector<5x5xf32>
    %80 = arith.subf %76, %79 : vector<5x5xf32>
    %81 = math.exp %80 : vector<5x5xf32>
    %cst_57 = arith.constant dense<0.000000e+00> : vector<5xf32>
    %82 = vector.multi_reduction <add>, %81, %cst_57 [1] : vector<5x5xf32> to vector<5xf32>
    %83 = vector.shape_cast %82 : vector<5xf32> to vector<5x1xf32>
    %84 = tpu.reciprocal %83 {approx = true} : vector<5x1xf32> -> vector<5x1xf32>
    %85 = vector.broadcast %84 : vector<5x1xf32> to vector<5x5xf32>
    %86 = arith.mulf %81, %85 : vector<5x5xf32>
    %cst_58 = arith.constant dense<0.000000e+00> : vector<5x16xf32>
    %87 = tpu.matmul %86, %75, %cst_58 {dimension_numbers = #tpu.dot_dimension_numbers<[1], [0], [0], [1], [0, 0, 1, 1], [], []>} : vector<5x5xf32>, vector<5x16xf32>, vector<5x16xf32> -> vector<5x16xf32>
    %c0_59 = arith.constant 0 : index
    %c0_60 = arith.constant 0 : index
    %c0_61 = arith.constant 0 : index
    %c0_62 = arith.constant 0 : index
    %88 = vector.load %arg14[%c0_59, %c0_60, %c0_61, %c0_62] : memref<1x2x16x32xf32, #tpu.memory_space<vmem>>, vector<1x1x16x32xf32>
    %89 = vector.shape_cast %88 : vector<1x1x16x32xf32> to vector<16x32xf32>
    %cst_63 = arith.constant dense<0.000000e+00> : vector<5x32xf32>
    %90 = tpu.matmul %87, %89, %cst_63 {dimension_numbers = #tpu.dot_dimension_numbers<[1], [0], [0], [1], [0, 0, 1, 1], [], []>} : vector<5x16xf32>, vector<16x32xf32>, vector<5x32xf32> -> vector<5x32xf32>
    %91 = arith.addf %52, %90 : vector<5x32xf32>
    %c0_64 = arith.constant 0 : index
    %c1 = arith.constant 1 : index
    %c0_65 = arith.constant 0 : index
    %c0_66 = arith.constant 0 : index
    %92 = vector.load %arg8[%c0_64, %c1, %c0_65, %c0_66] : memref<1x2x32x16xf32, #tpu.memory_space<vmem>>, vector<1x1x32x16xf32>
    %93 = vector.shape_cast %92 : vector<1x1x32x16xf32> to vector<32x16xf32>
    %cst_67 = arith.constant dense<0.000000e+00> : vector<5x16xf32>
    %94 = tpu.matmul %51, %93, %cst_67 {dimension_numbers = #tpu.dot_dimension_numbers<[1], [0], [0], [1], [0, 0, 1, 1], [], []>} : vector<5x32xf32>, vector<32x16xf32>, vector<5x16xf32> -> vector<5x16xf32>
    %c0_68 = arith.constant 0 : index
    %c1_69 = arith.constant 1 : index
    %c0_70 = arith.constant 0 : index
    %c0_71 = arith.constant 0 : index
    %95 = vector.load %arg9[%c0_68, %c1_69, %c0_70, %c0_71] : memref<1x2x1x16xf32, #tpu.memory_space<vmem>>, vector<1x1x1x16xf32>
    %96 = vector.shape_cast %95 : vector<1x1x1x16xf32> to vector<1x16xf32>
    %97 = vector.broadcast %96 : vector<1x16xf32> to vector<5x16xf32>
    %98 = arith.addf %94, %97 : vector<5x16xf32>
    %cst_72 = arith.constant 2.500000e-01 : f32
    %99 = vector.broadcast %cst_72 : f32 to vector<5x16xf32>
    %100 = arith.mulf %98, %99 : vector<5x16xf32>
    %c0_73 = arith.constant 0 : index
    %c1_74 = arith.constant 1 : index
    %c0_75 = arith.constant 0 : index
    %c0_76 = arith.constant 0 : index
    %101 = vector.load %arg10[%c0_73, %c1_74, %c0_75, %c0_76] : memref<1x2x32x16xf32, #tpu.memory_space<vmem>>, vector<1x1x32x16xf32>
    %102 = vector.shape_cast %101 : vector<1x1x32x16xf32> to vector<32x16xf32>
    %cst_77 = arith.constant dense<0.000000e+00> : vector<5x16xf32>
    %103 = tpu.matmul %51, %102, %cst_77 {dimension_numbers = #tpu.dot_dimension_numbers<[1], [0], [0], [1], [0, 0, 1, 1], [], []>} : vector<5x32xf32>, vector<32x16xf32>, vector<5x16xf32> -> vector<5x16xf32>
    %c0_78 = arith.constant 0 : index
    %c1_79 = arith.constant 1 : index
    %c0_80 = arith.constant 0 : index
    %c0_81 = arith.constant 0 : index
    %104 = vector.load %arg11[%c0_78, %c1_79, %c0_80, %c0_81] : memref<1x2x1x16xf32, #tpu.memory_space<vmem>>, vector<1x1x1x16xf32>
    %105 = vector.shape_cast %104 : vector<1x1x1x16xf32> to vector<1x16xf32>
    %106 = vector.broadcast %105 : vector<1x16xf32> to vector<5x16xf32>
    %107 = arith.addf %103, %106 : vector<5x16xf32>
    %c0_82 = arith.constant 0 : index
    %c1_83 = arith.constant 1 : index
    %c0_84 = arith.constant 0 : index
    %c0_85 = arith.constant 0 : index
    %108 = vector.load %arg12[%c0_82, %c1_83, %c0_84, %c0_85] : memref<1x2x32x16xf32, #tpu.memory_space<vmem>>, vector<1x1x32x16xf32>
    %109 = vector.shape_cast %108 : vector<1x1x32x16xf32> to vector<32x16xf32>
    %cst_86 = arith.constant dense<0.000000e+00> : vector<5x16xf32>
    %110 = tpu.matmul %51, %109, %cst_86 {dimension_numbers = #tpu.dot_dimension_numbers<[1], [0], [0], [1], [0, 0, 1, 1], [], []>} : vector<5x32xf32>, vector<32x16xf32>, vector<5x16xf32> -> vector<5x16xf32>
    %c0_87 = arith.constant 0 : index
    %c1_88 = arith.constant 1 : index
    %c0_89 = arith.constant 0 : index
    %c0_90 = arith.constant 0 : index
    %111 = vector.load %arg13[%c0_87, %c1_88, %c0_89, %c0_90] : memref<1x2x1x16xf32, #tpu.memory_space<vmem>>, vector<1x1x1x16xf32>
    %112 = vector.shape_cast %111 : vector<1x1x1x16xf32> to vector<1x16xf32>
    %113 = vector.broadcast %112 : vector<1x16xf32> to vector<5x16xf32>
    %114 = arith.addf %110, %113 : vector<5x16xf32>
    %cst_91 = arith.constant dense<0.000000e+00> : vector<5x5xf32>
    %115 = tpu.matmul %100, %107, %cst_91 {dimension_numbers = #tpu.dot_dimension_numbers<[1], [1], [0], [0], [0, 0, 1, 0], [], []>} : vector<5x16xf32>, vector<5x16xf32>, vector<5x5xf32> -> vector<5x5xf32>
    %cst_92 = arith.constant dense<0xFF800000> : vector<5xf32>
    %116 = vector.multi_reduction <maximumf>, %115, %cst_92 [1] : vector<5x5xf32> to vector<5xf32>
    %117 = vector.shape_cast %116 : vector<5xf32> to vector<5x1xf32>
    %118 = vector.broadcast %117 : vector<5x1xf32> to vector<5x5xf32>
    %119 = arith.subf %115, %118 : vector<5x5xf32>
    %120 = math.exp %119 : vector<5x5xf32>
    %cst_93 = arith.constant dense<0.000000e+00> : vector<5xf32>
    %121 = vector.multi_reduction <add>, %120, %cst_93 [1] : vector<5x5xf32> to vector<5xf32>
    %122 = vector.shape_cast %121 : vector<5xf32> to vector<5x1xf32>
    %123 = tpu.reciprocal %122 {approx = true} : vector<5x1xf32> -> vector<5x1xf32>
    %124 = vector.broadcast %123 : vector<5x1xf32> to vector<5x5xf32>
    %125 = arith.mulf %120, %124 : vector<5x5xf32>
    %cst_94 = arith.constant dense<0.000000e+00> : vector<5x16xf32>
    %126 = tpu.matmul %125, %114, %cst_94 {dimension_numbers = #tpu.dot_dimension_numbers<[1], [0], [0], [1], [0, 0, 1, 1], [], []>} : vector<5x5xf32>, vector<5x16xf32>, vector<5x16xf32> -> vector<5x16xf32>
    %c0_95 = arith.constant 0 : index
    %c1_96 = arith.constant 1 : index
    %c0_97 = arith.constant 0 : index
    %c0_98 = arith.constant 0 : index
    %127 = vector.load %arg14[%c0_95, %c1_96, %c0_97, %c0_98] : memref<1x2x16x32xf32, #tpu.memory_space<vmem>>, vector<1x1x16x32xf32>
    %128 = vector.shape_cast %127 : vector<1x1x16x32xf32> to vector<16x32xf32>
    %cst_99 = arith.constant dense<0.000000e+00> : vector<5x32xf32>
    %129 = tpu.matmul %126, %128, %cst_99 {dimension_numbers = #tpu.dot_dimension_numbers<[1], [0], [0], [1], [0, 0, 1, 1], [], []>} : vector<5x16xf32>, vector<16x32xf32>, vector<5x32xf32> -> vector<5x32xf32>
    %130 = arith.addf %91, %129 : vector<5x32xf32>
    %131 = arith.addf %27, %130 : vector<5x32xf32>
    %c0_100 = arith.constant 0 : index
    %c0_101 = arith.constant 0 : index
    %c0_102 = arith.constant 0 : index
    %132 = vector.load %arg15[%c0_100, %c0_101, %c0_102] : memref<1x1x32xf32, #tpu.memory_space<vmem>>, vector<1x1x32xf32>
    %133 = vector.shape_cast %132 : vector<1x1x32xf32> to vector<1x32xf32>
    %134 = vector.broadcast %133 : vector<1x32xf32> to vector<5x32xf32>
    %135 = arith.addf %131, %134 : vector<5x32xf32>
    %c0_103 = arith.constant 0 : index
    %c0_104 = arith.constant 0 : index
    %c0_105 = arith.constant 0 : index
    %136 = vector.load %arg16[%c0_103, %c0_104, %c0_105] : memref<1x1x32xf32, #tpu.memory_space<vmem>>, vector<1x1x32xf32>
    %137 = vector.shape_cast %136 : vector<1x1x32xf32> to vector<1x32xf32>
    %c0_106 = arith.constant 0 : index
    %c0_107 = arith.constant 0 : index
    %c0_108 = arith.constant 0 : index
    %138 = vector.load %arg17[%c0_106, %c0_107, %c0_108] : memref<1x1x32xf32, #tpu.memory_space<vmem>>, vector<1x1x32xf32>
    %139 = vector.shape_cast %138 : vector<1x1x32xf32> to vector<1x32xf32>
    %cst_109 = arith.constant dense<0.000000e+00> : vector<5xf32>
    %140 = vector.multi_reduction <add>, %135, %cst_109 [1] : vector<5x32xf32> to vector<5xf32>
    %141 = vector.shape_cast %140 : vector<5xf32> to vector<5x1xf32>
    %cst_110 = arith.constant 3.200000e+01 : f32
    %142 = vector.broadcast %cst_110 : f32 to vector<5x1xf32>
    %143 = arith.divf %141, %142 : vector<5x1xf32>
    %144 = vector.broadcast %143 : vector<5x1xf32> to vector<5x32xf32>
    %145 = arith.subf %135, %144 : vector<5x32xf32>
    %146 = arith.mulf %145, %145 : vector<5x32xf32>
    %cst_111 = arith.constant dense<0.000000e+00> : vector<5xf32>
    %147 = vector.multi_reduction <add>, %146, %cst_111 [1] : vector<5x32xf32> to vector<5xf32>
    %148 = vector.shape_cast %147 : vector<5xf32> to vector<5x1xf32>
    %cst_112 = arith.constant 3.200000e+01 : f32
    %149 = vector.broadcast %cst_112 : f32 to vector<5x1xf32>
    %150 = arith.divf %148, %149 : vector<5x1xf32>
    %cst_113 = arith.constant 9.99999974E-6 : f32
    %151 = vector.broadcast %cst_113 : f32 to vector<5x1xf32>
    %152 = arith.addf %150, %151 : vector<5x1xf32>
    %153 = math.rsqrt %152 : vector<5x1xf32>
    %154 = vector.broadcast %153 : vector<5x1xf32> to vector<5x32xf32>
    %155 = arith.mulf %145, %154 : vector<5x32xf32>
    %156 = vector.broadcast %137 : vector<1x32xf32> to vector<5x32xf32>
    %157 = arith.mulf %155, %156 : vector<5x32xf32>
    %158 = vector.broadcast %139 : vector<1x32xf32> to vector<5x32xf32>
    %159 = arith.addf %157, %158 : vector<5x32xf32>
    %c0_114 = arith.constant 0 : index
    %c0_115 = arith.constant 0 : index
    %c0_116 = arith.constant 0 : index
    %160 = vector.load %arg18[%c0_114, %c0_115, %c0_116] : memref<1x32x64xf32, #tpu.memory_space<vmem>>, vector<1x32x64xf32>
    %161 = vector.shape_cast %160 : vector<1x32x64xf32> to vector<32x64xf32>
    %cst_117 = arith.constant dense<0.000000e+00> : vector<5x64xf32>
    %162 = tpu.matmul %159, %161, %cst_117 {dimension_numbers = #tpu.dot_dimension_numbers<[1], [0], [0], [1], [0, 0, 1, 1], [], []>} : vector<5x32xf32>, vector<32x64xf32>, vector<5x64xf32> -> vector<5x64xf32>
    %c0_118 = arith.constant 0 : index
    %c0_119 = arith.constant 0 : index
    %c0_120 = arith.constant 0 : index
    %163 = vector.load %arg19[%c0_118, %c0_119, %c0_120] : memref<1x1x64xf32, #tpu.memory_space<vmem>>, vector<1x1x64xf32>
    %164 = vector.shape_cast %163 : vector<1x1x64xf32> to vector<1x64xf32>
    %165 = vector.broadcast %164 : vector<1x64xf32> to vector<5x64xf32>
    %166 = arith.addf %162, %165 : vector<5x64xf32>
    %cst_121 = arith.constant 1.702000e+00 : f32
    %167 = vector.broadcast %cst_121 : f32 to vector<5x64xf32>
    %168 = arith.mulf %167, %166 : vector<5x64xf32>
    %169 = arith.negf %168 : vector<5x64xf32>
    %170 = math.exp %169 : vector<5x64xf32>
    %cst_122 = arith.constant 1.000000e+00 : f32
    %171 = vector.broadcast %cst_122 : f32 to vector<5x64xf32>
    %172 = arith.addf %171, %170 : vector<5x64xf32>
    %173 = arith.divf %171, %172 : vector<5x64xf32>
    %174 = arith.mulf %166, %173 : vector<5x64xf32>
    %c0_123 = arith.constant 0 : index
    %c0_124 = arith.constant 0 : index
    %c0_125 = arith.constant 0 : index
    %175 = vector.load %arg20[%c0_123, %c0_124, %c0_125] : memref<1x64x32xf32, #tpu.memory_space<vmem>>, vector<1x64x32xf32>
    %176 = vector.shape_cast %175 : vector<1x64x32xf32> to vector<64x32xf32>
    %cst_126 = arith.constant dense<0.000000e+00> : vector<5x32xf32>
    %177 = tpu.matmul %174, %176, %cst_126 {dimension_numbers = #tpu.dot_dimension_numbers<[1], [0], [0], [1], [0, 0, 1, 1], [], []>} : vector<5x64xf32>, vector<64x32xf32>, vector<5x32xf32> -> vector<5x32xf32>
    %178 = arith.addf %135, %177 : vector<5x32xf32>
    %c0_127 = arith.constant 0 : index
    %c0_128 = arith.constant 0 : index
    %c0_129 = arith.constant 0 : index
    %179 = vector.load %arg21[%c0_127, %c0_128, %c0_129] : memref<1x1x32xf32, #tpu.memory_space<vmem>>, vector<1x1x32xf32>
    %180 = vector.shape_cast %179 : vector<1x1x32xf32> to vector<1x32xf32>
    %181 = vector.broadcast %180 : vector<1x32xf32> to vector<5x32xf32>
    %182 = arith.addf %178, %181 : vector<5x32xf32>
    %c0_130 = arith.constant 0 : index
    %c0_131 = arith.constant 0 : index
    %c0_132 = arith.constant 0 : index
    %183 = vector.load %arg22[%c0_130, %c0_131, %c0_132] : memref<1x5x32xf32, #tpu.memory_space<vmem>>, vector<1x5x32xf32>
    %184 = vector.shape_cast %183 : vector<1x5x32xf32> to vector<5x32xf32>
    %185 = vector.shape_cast %182 : vector<5x32xf32> to vector<1x5x32xf32>
    tpu.vector_store %arg22[%c0_130, %c0_131, %c0_132], %185 {strides = array<i32>} : memref<1x5x32xf32, #tpu.memory_space<vmem>>, vector<1x5x32xf32>,
    return
  }
  func.func @transform_0(%arg0: i32) -> (i32, i32, i32) {
    %c0_i32 = arith.constant 0 : i32
    %c0_i32_0 = arith.constant 0 : i32
    %c0_i32_1 = arith.constant 0 : i32
    return %arg0, %c0_i32, %c0_i32_0 : i32, i32, i32
  }
  func.func @transform_1(%arg0: i32) -> (i32, i32) {
    %c0_i32 = arith.constant 0 : i32
    %c0_i32_0 = arith.constant 0 : i32
    %c0_i32_1 = arith.constant 0 : i32
    return %c0_i32, %c0_i32_0 : i32, i32
  }
  func.func @transform_2(%arg0: i32) -> (i32, i32) {
    %c0_i32 = arith.constant 0 : i32
    %c0_i32_0 = arith.constant 0 : i32
    %c0_i32_1 = arith.constant 0 : i32
    return %c0_i32, %c0_i32_0 : i32, i32
  }
  func.func @transform_3(%arg0: i32) -> (i32, i32) {
    %c0_i32 = arith.constant 0 : i32
    %c0_i32_0 = arith.constant 0 : i32
    %c0_i32_1 = arith.constant 0 : i32
    return %c0_i32, %c0_i32_0 : i32, i32
  }
  func.func @transform_4(%arg0: i32) -> (i32, i32) {
    %c0_i32 = arith.constant 0 : i32
    %c0_i32_0 = arith.constant 0 : i32
    %c0_i32_1 = arith.constant 0 : i32
    return %c0_i32, %c0_i32_0 : i32, i32
  }
  func.func @transform_5(%arg0: i32) -> (i32, i32, i32) {
    %c0_i32 = arith.constant 0 : i32
    %c0_i32_0 = arith.constant 0 : i32
    %c0_i32_1 = arith.constant 0 : i32
    %c0_i32_2 = arith.constant 0 : i32
    return %c0_i32, %c0_i32_0, %c0_i32_1 : i32, i32, i32
  }
  func.func @transform_6(%arg0: i32) -> (i32, i32, i32) {
    %c0_i32 = arith.constant 0 : i32
    %c0_i32_0 = arith.constant 0 : i32
    %c0_i32_1 = arith.constant 0 : i32
    %c0_i32_2 = arith.constant 0 : i32
    return %c0_i32, %c0_i32_0, %c0_i32_1 : i32, i32, i32
  }
  func.func @transform_7(%arg0: i32) -> (i32, i32, i32, i32) {
    %c0_i32 = arith.constant 0 : i32
    %c0_i32_0 = arith.constant 0 : i32
    %c0_i32_1 = arith.constant 0 : i32
    %c0_i32_2 = arith.constant 0 : i32
    %c0_i32_3 = arith.constant 0 : i32
    return %c0_i32, %c0_i32_0, %c0_i32_1, %c0_i32_2 : i32, i32, i32, i32
  }
  func.func @transform_8(%arg0: i32) -> (i32, i32, i32, i32) {
    %c0_i32 = arith.constant 0 : i32
    %c0_i32_0 = arith.constant 0 : i32
    %c0_i32_1 = arith.constant 0 : i32
    %c0_i32_2 = arith.constant 0 : i32
    %c0_i32_3 = arith.constant 0 : i32
    return %c0_i32, %c0_i32_0, %c0_i32_1, %c0_i32_2 : i32, i32, i32, i32
  }
  func.func @transform_9(%arg0: i32) -> (i32, i32, i32, i32) {
    %c0_i32 = arith.constant 0 : i32
    %c0_i32_0 = arith.constant 0 : i32
    %c0_i32_1 = arith.constant 0 : i32
    %c0_i32_2 = arith.constant 0 : i32
    %c0_i32_3 = arith.constant 0 : i32
    return %c0_i32, %c0_i32_0, %c0_i32_1, %c0_i32_2 : i32, i32, i32, i32
  }
  func.func @transform_10(%arg0: i32) -> (i32, i32, i32, i32) {
    %c0_i32 = arith.constant 0 : i32
    %c0_i32_0 = arith.constant 0 : i32
    %c0_i32_1 = arith.constant 0 : i32
    %c0_i32_2 = arith.constant 0 : i32
    %c0_i32_3 = arith.constant 0 : i32
    return %c0_i32, %c0_i32_0, %c0_i32_1, %c0_i32_2 : i32, i32, i32, i32
  }
  func.func @transform_11(%arg0: i32) -> (i32, i32, i32, i32) {
    %c0_i32 = arith.constant 0 : i32
    %c0_i32_0 = arith.constant 0 : i32
    %c0_i32_1 = arith.constant 0 : i32
    %c0_i32_2 = arith.constant 0 : i32
    %c0_i32_3 = arith.constant 0 : i32
    return %c0_i32, %c0_i32_0, %c0_i32_1, %c0_i32_2 : i32, i32, i32, i32
  }
  func.func @transform_12(%arg0: i32) -> (i32, i32, i32, i32) {
    %c0_i32 = arith.constant 0 : i32
    %c0_i32_0 = arith.constant 0 : i32
    %c0_i32_1 = arith.constant 0 : i32
    %c0_i32_2 = arith.constant 0 : i32
    %c0_i32_3 = arith.constant 0 : i32
    return %c0_i32, %c0_i32_0, %c0_i32_1, %c0_i32_2 : i32, i32, i32, i32
  }
  func.func @transform_13(%arg0: i32) -> (i32, i32, i32, i32) {
    %c0_i32 = arith.constant 0 : i32
    %c0_i32_0 = arith.constant 0 : i32
    %c0_i32_1 = arith.constant 0 : i32
    %c0_i32_2 = arith.constant 0 : i32
    %c0_i32_3 = arith.constant 0 : i32
    return %c0_i32, %c0_i32_0, %c0_i32_1, %c0_i32_2 : i32, i32, i32, i32
  }
  func.func @transform_14(%arg0: i32) -> (i32, i32, i32) {
    %c0_i32 = arith.constant 0 : i32
    %c0_i32_0 = arith.constant 0 : i32
    %c0_i32_1 = arith.constant 0 : i32
    %c0_i32_2 = arith.constant 0 : i32
    return %c0_i32, %c0_i32_0, %c0_i32_1 : i32, i32, i32
  }
  func.func @transform_15(%arg0: i32) -> (i32, i32, i32) {
    %c0_i32 = arith.constant 0 : i32
    %c0_i32_0 = arith.constant 0 : i32
    %c0_i32_1 = arith.constant 0 : i32
    %c0_i32_2 = arith.constant 0 : i32
    return %c0_i32, %c0_i32_0, %c0_i32_1 : i32, i32, i32
  }
  func.func @transform_16(%arg0: i32) -> (i32, i32, i32) {
    %c0_i32 = arith.constant 0 : i32
    %c0_i32_0 = arith.constant 0 : i32
    %c0_i32_1 = arith.constant 0 : i32
    %c0_i32_2 = arith.constant 0 : i32
    return %c0_i32, %c0_i32_0, %c0_i32_1 : i32, i32, i32
  }
  func.func @transform_17(%arg0: i32) -> (i32, i32, i32) {
    %c0_i32 = arith.constant 0 : i32
    %c0_i32_0 = arith.constant 0 : i32
    %c0_i32_1 = arith.constant 0 : i32
    %c0_i32_2 = arith.constant 0 : i32
    return %c0_i32, %c0_i32_0, %c0_i32_1 : i32, i32, i32
  }
  func.func @transform_18(%arg0: i32) -> (i32, i32, i32) {
    %c0_i32 = arith.constant 0 : i32
    %c0_i32_0 = arith.constant 0 : i32
    %c0_i32_1 = arith.constant 0 : i32
    %c0_i32_2 = arith.constant 0 : i32
    return %c0_i32, %c0_i32_0, %c0_i32_1 : i32, i32, i32
  }
  func.func @transform_19(%arg0: i32) -> (i32, i32, i32) {
    %c0_i32 = arith.constant 0 : i32
    %c0_i32_0 = arith.constant 0 : i32
    %c0_i32_1 = arith.constant 0 : i32
    %c0_i32_2 = arith.constant 0 : i32
    return %c0_i32, %c0_i32_0, %c0_i32_1 : i32, i32, i32
  }
  func.func @transform_20(%arg0: i32) -> (i32, i32, i32) {
    %c0_i32 = arith.constant 0 : i32
    %c0_i32_0 = arith.constant 0 : i32
    %c0_i32_1 = arith.constant 0 : i32
    %c0_i32_2 = arith.constant 0 : i32
    return %c0_i32, %c0_i32_0, %c0_i32_1 : i32, i32, i32
  }
  func.func @transform_21(%arg0: i32) -> (i32, i32, i32) {
    %c0_i32 = arith.constant 0 : i32
    %c0_i32_0 = arith.constant 0 : i32
    %c0_i32_1 = arith.constant 0 : i32
    return %arg0, %c0_i32, %c0_i32_0 : i32, i32, i32
  }
}

</mosaic_0001>

<bundles_post_ra>
// kernel: tpu_custom_call.1
= control target key start
LH: loop header
LB: loop body
LE: loop exit
PB: predicated region body
PF: predicated region fallthrough
CT: control target
= control target key end

     0   :  { %s2943_s0 = inlined_call_operand.vmem [shape: f32[2,5,192], index: 0, kind: input, shape index: {}]   ;;  %s2944_s1 = inlined_call_operand.vmem [shape: f32[192,32], index: 1, kind: input, shape index: {}]   ;;  %s2945_s2 = inlined_call_operand.vmem [shape: f32[5,32], index: 2, kind: input, shape index: {}]   ;;  %s2946_s3 = inlined_call_operand.vmem [shape: f32[1,32], index: 3, kind: input, shape index: {}]   ;;  %s2947_s4 = inlined_call_operand.vmem [shape: f32[1,32], index: 4, kind: input, shape index: {}]   ;;  %s2948_s5 = inlined_call_operand.vmem [shape: f32[1,1,32], index: 5, kind: input, shape index: {}]   ;;  %s2949_s6 = inlined_call_operand.vmem [shape: f32[1,1,32], index: 6, kind: input, shape index: {}]   ;;  %s2950_s7 = inlined_call_operand.vmem [shape: f32[1,2,32,16], index: 7, kind: input, shape index: {}]   ;;  %s2951_s8 = inlined_call_operand.vmem [shape: f32[1,2,1,16], index: 8, kind: input, shape index: {}]   ;;  %s2952_s9 = inlined_call_operand.vmem [shape: f32[1,2,32,16], index: 9, kind: input, shape index: {}]   ;;  %s2953_s10 = inlined_call_operand.vmem [shape: f32[1,2,1,16], index: 10, kind: input, shape index: {}]   ;;  %s2954_s11 = inlined_call_operand.vmem [shape: f32[1,2,32,16], index: 11, kind: input, shape index: {}]   ;;  %s2955_s12 = inlined_call_operand.vmem [shape: f32[1,2,1,16], index: 12, kind: input, shape index: {}]   ;;  %s2956_s13 = inlined_call_operand.vmem [shape: f32[1,2,16,32], index: 13, kind: input, shape index: {}]   ;;  %s2957_s14 = inlined_call_operand.vmem [shape: f32[1,1,32], index: 14, kind: input, shape index: {}]   ;;  %s2958_s15 = inlined_call_operand.vmem [shape: f32[1,1,32], index: 15, kind: input, shape index: {}]   ;;  %s2959_s16 = inlined_call_operand.vmem [shape: f32[1,1,32], index: 16, kind: input, shape index: {}]   ;;  %s2960_s17 = inlined_call_operand.vmem [shape: f32[1,32,64], index: 17, kind: input, shape index: {}]   ;;  %s2961_s18 = inlined_call_operand.vmem [shape: f32[1,1,64], index: 18, kind: input, shape index: {}]   ;;  %s2962_s19 = inlined_call_operand.vmem [shape: f32[1,64,32], index: 19, kind: input, shape index: {}]   ;;  %s2963_s20 = inlined_call_operand.vmem [shape: f32[1,1,32], index: 20, kind: input, shape index: {}]   ;;  %s2964_s21 = inlined_call_operand.vmem [shape: f32[2,5,32], index: 21, kind: output, shape index: {}]  }
   0x1   :  { %2966 = sst [smem:[#allocation2_spill]] %s2943_s0 }
   0x2   :  { %2967 = sst [smem:[#allocation3_spill]] %s2944_s1 }
   0x3   :  { %2968 = sst [smem:[#allocation4_spill]] %s2945_s2  ;;  %s2566_s2 = smov 0  }
   0x4   :  { %2969 = sst [smem:[#allocation5_spill]] %s2946_s3 }
   0x5   :  { %2970 = sst [smem:[#allocation6_spill]] %s2947_s4 }
   0x6   :  { %2971 = sst [smem:[#allocation7_spill]] %s2948_s5 }
   0x7 LB: > { %s2069_s25 = sadd.s32 4294967295, %s2451_s2   ;;  %p2073_p0 = scmp.ge.s32.totalorder %s2451_s2, 1  ;;  %s2451_s2 = sphi %s2566_s2, %s31_s2  }
   0x8   : > { %p587_p1 = scmp.lt.s32.totalorder %s2451_s2, 3 }
   0xa   : > { %p588_p2 = pnand %p2073_p0, %p587_p1 }
   0xb   : > { %s2972_s3 = sld [smem:[#allocation3_spill]] (!%p588_p2)  ;;  %p646_p3 = scmp.lt.s32.totalorder (!%p588_p2), %s2069_s25, 1  ;;  %v2453_v3 = vmov (!%p588_p2), 0.0|0.0   ;;  %vm682_vm0 = vcmask (!%p588_p2), 523264   ;;  %vm758_vm1 = vcmask (!%p588_p2), 258048   ;;  %vm2454_vm2 = vmmov (!%p588_p2), 0  }
   0xc   : > { %591 = sbr.rel (%p588_p2) target bundleno = 3621 (0xe25), region = 104  ;;  %2320 = vmatprep.subr.bf16.mxu0 (!%p588_p2), %v2453_v3  ;;  %2356 = vmatprep.subr.bf16.mxu1 (!%p588_p2), %v2453_v3  ;;  %s2973_s29 = sld [smem:[#allocation2_spill]] (!%p588_p2)  ;;  %vm827_vm3 = vcmask (!%p588_p2), 261120   ;;  %vm1064_vm4 = vcmask (!%p588_p2), 130048   ;;  %vm1157_vm5 = vcmask (!%p588_p2), 1044480   ;;  %vm1141_vm6 = vcmask (!%p588_p2), 36864  }
   0xd   : > { %s2974_s1 = sld [smem:[#allocation4_spill]] (!%p588_p2)  ;;  %s2977_s28 = sld [smem:[#allocation7_spill]] (!%p588_p2)  ;;  %vm1153_vm7 = vcmask (!%p588_p2), 39936  }
  0x11   : > { %v657_v0 = vld [vmem:[%s2972_s3] sm:$0xff] (!%p588_p2)  ;;  %v658_v1 = vld [vmem:[%s2972_s3 + $0x8] sm:$0xff] (!%p588_p2)  ;;  %v659_v2 = vld [vmem:[%s2972_s3 + $0x10] sm:$0xff] (!%p588_p2) }
  0x12   : > { %v2321_v4 = vpack.c.bf16 (!%p588_p2), %v658_v1, %v657_v0  ;;  %v660_v5 = vld [vmem:[%s2972_s3 + $0x18] sm:$0xff] (!%p588_p2)  ;;  %v661_v7 = vld [vmem:[%s2972_s3 + $0x20] sm:$0xff] (!%p588_p2)  ;;  %v662_v8 = vld [vmem:[%s2972_s3 + $0x28] sm:$0xff] (!%p588_p2) }
  0x13   : > { %s2979_s25 = smov (!%p646_p3, %s2069_s25), 1  ;;  %v2324_v6 = vpack.c.bf16 %v660_v5, %v659_v2  ;;  %v2327_v9 = vpack.c.bf16 %v662_v8, %v661_v7  ;;  %v663_v10 = vld [vmem:[%s2972_s3 + $0x30] sm:$0xff]  ;;  %v664_v11 = vld [vmem:[%s2972_s3 + $0x38] sm:$0xff]  ;;  %v665_v14 = vld [vmem:[%s2972_s3 + $0x40] sm:$0xff]  ;;  %v2455_v7 = vmov 0.0  }
  0x14   : > { %2322 = vmatpush1.bf16.msra.mxu0 %v2321_v4  ;;  %s2131_s26 = sshll.u32 %s2979_s25, 4  ;;  %v2330_v13 = vpack.c.bf16 %v664_v11, %v663_v10  ;;  %v666_v15 = vld [vmem:[%s2972_s3 + $0x48] sm:$0xff]  ;;  %v667_v17 = vld [vmem:[%s2972_s3 + $0x50] sm:$0xff]  ;;  %v668_v18 = vld [vmem:[%s2972_s3 + $0x58] sm:$0xff]  ;;  %2198 = vmatprep.mubr.msk.f32.mxu1 %vm2454_vm2, %v2455_v7  ;;  %s2076_s27 = sshll.u32 %s2979_s25, 3 }
  0x15   : > { %2323 = vmatprep.subr.bf16.mxu0 %v2453_v3  ;;  %s2601_s0 = scalar_lea.vmem %s2973_s29, %s2131_s26  ;;  %v2333_v16 = vpack.c.bf16 %v666_v15, %v665_v14  ;;  %v2336_v19 = vpack.c.bf16 %v668_v18, %v667_v17  ;;  %v669_v20 = vld [vmem:[%s2972_s3 + $0x60] sm:$0xff]  ;;  %v670_v21 = vld [vmem:[%s2972_s3 + $0x68] sm:$0xff]  ;;  %v671_v23 = vld [vmem:[%s2972_s3 + $0x70] sm:$0xff]  ;;  %s2975_s26 = sld [smem:[#allocation5_spill]] }
  0x16   : > { %v656_v12 = vld [vmem:[%s2601_s0 + $0x8] sm:$0x1f]  ;;  %v2339_v22 = vpack.c.bf16 %v670_v21, %v669_v20  ;;  %v672_v24 = vld [vmem:[%s2972_s3 + $0x78] sm:$0xff]  ;;  %v673_v26 = vld [vmem:[%s2972_s3 + $0x80] sm:$0xff]  ;;  %s2976_s29 = sld [smem:[#allocation6_spill]]  ;;  %s654_s5 = scalar_lea.vmem %s2964_s21, %s2076_s27 }
  0x17   : > { %2077 = vmatprep.mubr.msk.f32.mxu0 %vm682_vm0, %v656_v12  ;;  %v2342_v25 = vpack.c.bf16 %v672_v24, %v671_v23  ;;  %v674_v27 = vld [vmem:[%s2972_s3 + $0x88] sm:$0xff]  ;;  %v675_v29 = vld [vmem:[%s2972_s3 + $0x90] sm:$0xff]  ;;  %v676_v30 = vld [vmem:[%s2972_s3 + $0x98] sm:$0xff] }
  0x18   : > { %2325 = vmatpush1.bf16.msra.mxu0 %v2324_v6  ;;  %v2345_v28 = vpack.c.bf16 %v674_v27, %v673_v26  ;;  %v2348_v31 = vpack.c.bf16 %v676_v30, %v675_v29  ;;  %v677_v32 = vld [vmem:[%s2972_s3 + $0xa0] sm:$0xff]  ;;  %v678_v33 = vld [vmem:[%s2972_s3 + $0xa8] sm:$0xff]  ;;  %v679_v35 = vld [vmem:[%s2972_s3 + $0xb0] sm:$0xff] }
  0x19   : > { %2326 = vmatprep.subr.bf16.mxu0 %v2453_v3  ;;  %v2351_v34 = vpack.c.bf16 %v678_v33, %v677_v32  ;;  %v680_v36 = vld [vmem:[%s2972_s3 + $0xb8] sm:$0xff]  ;;  %v655_v38 = vld [vmem:[%s2601_s0] sm:$0x1f]  ;;  %v817_v1 = vld [vmem:[%s2950_s7 + $0x8] sm:$0xff] }
  0x1a   : > { %v2354_v37 = vpack.c.bf16 %v680_v36, %v679_v35  ;;  %v681_v39 = vld [vmem:[%s2974_s1] sm:$0x1f]  ;;  %v818_v4 = vld [vmem:[%s2950_s7 + $0x10] sm:$0xff]  ;;  %v819_v5 = vld [vmem:[%s2950_s7 + $0x18] sm:$0xff] }
  0x1b   : > { %v2078_v53 = vld [vmem:[%s2975_s26] ss:$0 sm:$0xff]  ;;  %v2360_v6 = vpack.c.bf16 %v819_v5, %v818_v4  ;;  %v903_v15 = vld [vmem:[%s2952_s9 + $0x8] sm:$0xff]  ;;  %v904_v20 = vld [vmem:[%s2952_s9 + $0x10] sm:$0xff] }
  0x1c   : > { %2328 = vmatpush1.bf16.msra.mxu0 %v2327_v9  ;;  %v2079_v55 = vld [vmem:[%s2976_s29] ss:$0 sm:$0xff]  ;;  %v905_v21 = vld [vmem:[%s2952_s9 + $0x18] sm:$0xff]  ;;  %v984_v24 = vld [vmem:[%s2954_s11 + $0x8] sm:$0xff] }
  0x1d   : > { %2329 = vmatprep.subr.bf16.mxu0 %v2453_v3  ;;  %v816_v0 = vld [vmem:[%s2950_s7] sm:$0xff]  ;;  %v985_v26 = vld [vmem:[%s2954_s11 + $0x10] sm:$0xff]  ;;  %v986_v27 = vld [vmem:[%s2954_s11 + $0x18] sm:$0xff] }
  0x1e   : > { %v2357_v2 = vpack.c.bf16 %v817_v1, %v816_v0  ;;  %v2080_v12 = vld [vmem:[%s2977_s28] ss:$0 sm:$0xff]  ;;  %v2107_v36 = vld [vmem:[%s2954_s11 + $0x28] sm:$0xff]  ;;  %v2094_v1 = vld [vmem:[%s2950_s7 + $0x30] sm:$0xff] }
  0x1f   : > { %v902_v14 = vld [vmem:[%s2952_s9] sm:$0xff] }
  0x20   : > { %2331 = vmatpush1.bf16.msra.mxu0 %v2330_v13  ;;  %2358 = vmatpush3.bf16.msra.mxu1 %v2357_v2  ;;  %v2363_v18 = vpack.c.bf16 %v903_v15, %v902_v14  ;;  %v983_v23 = vld [vmem:[%s2954_s11] sm:$0xff]  ;;  %v2095_v2 = vld [vmem:[%s2950_s7 + $0x38] sm:$0xff] }
  0x21   : > { %2332 = vmatprep.subr.bf16.mxu0 %v2453_v3  ;;  %2359 = vmatprep.subr.bf16.mxu1 %v2453_v3  ;;  %v2084_v32 = vld [vmem:[%s2953_s10] ss:$0 sm:$0xff]  ;;  %v2378_v4 = vpack.c.bf16 %v2095_v2, %v2094_v1 }
  0x22   : > { %v2106_v35 = vld [vmem:[%s2954_s11 + $0x20] sm:$0xff] }
  0x23   : > { %v2099_v5 = vld [vmem:[%s2952_s9 + $0x20] sm:$0xff] }
  0x24   : > { %2334 = vmatpush1.bf16.msra.mxu0 %v2333_v16  ;;  %2361 = vmatpush3.bf16.msra.mxu1 %v2360_v6  ;;  %v2081_v16 = vld [vmem:[%s2949_s6] ss:$0 sm:$0xff]  ;;  %v2100_v6 = vld [vmem:[%s2952_s9 + $0x28] sm:$0xff] }
  0x25   : > { %2335 = vmatprep.subr.bf16.mxu0 %v2453_v3  ;;  %2362 = vmatprep.subr.bf16.mxu1 %v2453_v3 }
  0x28   : > { %2337 = vmatpush1.bf16.msra.mxu0 %v2336_v19 }
  0x29   : > { %2338 = vmatprep.subr.bf16.mxu0 %v2453_v3 }
  0x2c   : > { %2340 = vmatpush1.bf16.msra.mxu0 %v2339_v22  ;;  %v2366_v22 = vpack.c.bf16 %v905_v21, %v904_v20 }
  0x2d   : > { %2341 = vmatprep.subr.bf16.mxu0 %v2453_v3 }
  0x30   : > { %2343 = vmatpush1.bf16.msra.mxu0 %v2342_v25  ;;  %v2369_v25 = vpack.c.bf16 %v984_v24, %v983_v23 }
  0x31   : > { %2344 = vmatprep.subr.bf16.mxu0 %v2453_v3 }
  0x34   : > { %2346 = vmatpush1.bf16.msra.mxu0 %v2345_v28  ;;  %v2372_v28 = vpack.c.bf16 %v986_v27, %v985_v26 }
  0x35   : > { %2347 = vmatprep.subr.bf16.mxu0 %v2453_v3 }
  0x38   : > { %2349 = vmatpush1.bf16.msra.mxu0 %v2348_v31  ;;  %v2082_v31 = vld [vmem:[%s2951_s8] ss:$0 sm:$0xff] }
  0x39   : > { %2350 = vmatprep.subr.bf16.mxu0 %v2453_v3 }
  0x3c   : > { %2352 = vmatpush1.bf16.msra.mxu0 %v2351_v34 }
  0x3d   : > { %2353 = vmatprep.subr.bf16.mxu0 %v2453_v3 }
  0x40   : > { %2355 = vmatpush1.bf16.msra.mxu0 %v2354_v37 }
  0x41   : > { %2223 = vmatprep.subr.mxu0 %v2455_v7 }
  0x43   : > { %751 = vmatmul.mubr.f32.vlgmr.msra.gmra.mrb[0].mxu0 %v655_v38 }
  0x44   : > { %2225 = vmatprep.mubr.msk.f32.mxu0 %vm2454_vm2, %v2455_v7 }
 0x116   : > { %v752_v40 = vpop.f32.mrb[0].mxu0 }
 0x117   : > { %v753_v41 = vadd.f32 %v752_v40, %v681_v39  ;;  %v754_v42 = vpop.f32.mrb[1].mxu0  ;;  %v2387_v39 = vpack.c.bf16 %v2107_v36, %v2106_v35 }
 0x118   : > { %v2109_v42 = vld [vmem:[%s2954_s11 + $0x38] sm:$0xff] }
 0x119   : > { %v759_v43 = vsel %vm758_vm1, %v753_v41, 0.0 }
 0x11a   : > { %760 = vadd.xlane.f32.xlu0 %v759_v43  ;;  %v2086_v43 = vld [vmem:[%s2955_s12] ss:$0 sm:$0xff] }
 0x1a7   : > { %v761_v44 = vpop.xlane.xlu0 %760 }
 0x1a8   : > { %v763_v45 = vmul.f32 0.03125, %v761_v44 }
 0x1aa   : > { %v764_v46 = vsub.f32 %v753_v41, %v763_v45  ;;  %v2108_v41 = vld [vmem:[%s2954_s11 + $0x30] sm:$0xff] }
 0x1ab   : > { %v2390_v44 = vpack.c.bf16 %v2109_v42, %v2108_v41 }
 0x1ac   : > { %v765_v47 = vmul.f32 %v764_v46, %v764_v46 }
 0x1ae   : > { %v766_v48 = vsel %vm758_vm1, %v765_v47, 0.0 }
 0x1af   : > { %767 = vadd.xlane.f32.xlu0 %v766_v48 }
 0x23c   : > { %v768_v49 = vpop.xlane.xlu0 %767 }
 0x23d   : > { %v769_v50 = vmul.f32 0.03125, %v768_v49 }
 0x23f   : > { %v770_v51 = vadd.f32 1e-05, %v769_v50 }
 0x241   : > { %2427 = vrsqrt.f32 %v770_v51 }
 0x24b   : > { %v2428_v52 = vpop.eup %2427 }
 0x24c   : > { %v772_v54 = vmul.f32 %v2428_v52, %v764_v46 }
 0x24e   : > { %v779_v56 = vmul.f32 %v2078_v53, %v772_v54 }
 0x250   : > { %v2681_v57 = vadd.f32 %v2079_v55, %v779_v56 }
 0x252   : > { %v789_v58 = vsel %vm758_vm1, %v2681_v57, 0.0 }
 0x253   : > { %790 = vadd.xlane.f32.xlu1 %v789_v58 }
 0x2e0   : > { %v791_v59 = vpop.xlane.xlu1 %790 }
 0x2e1   : > { %v792_v60 = vmul.f32 0.03125, %v791_v59 }
 0x2e3   : > { %v793_v61 = vsub.f32 %v2681_v57, %v792_v60  ;;  %v2092_v60 = vld [vmem:[%s2950_s7 + $0x20] sm:$0xff] }
 0x2e5   : > { %v794_v62 = vmul.f32 %v793_v61, %v793_v61 }
 0x2e7   : > { %v795_v63 = vsel %vm758_vm1, %v794_v62, 0.0 }
 0x2e8   : > { %796 = vadd.xlane.f32.xlu1 %v795_v63 }
 0x375   : > { %v797_v8 = vpop.xlane.xlu1 %796 }
 0x376   : > { %v798_v9 = vmul.f32 0.03125, %v797_v8  ;;  %v2381_v8 = vpack.c.bf16 %v2100_v6, %v2099_v5  ;;  %v2123_v6 = vld [vmem:[%s2959_s16] ss:$0 sm:$0xff] }
 0x378   : > { %v799_v10 = vadd.f32 1e-05, %v798_v9  ;;  %v2101_v9 = vld [vmem:[%s2952_s9 + $0x30] sm:$0xff] }
 0x37a   : > { %2429 = vrsqrt.f32 %v799_v10  ;;  %v2102_v10 = vld [vmem:[%s2952_s9 + $0x38] sm:$0xff] }
 0x384   : > { %v2430_v11 = vpop.eup %2429 }
 0x385   : > { %v801_v13 = vmul.f32 %v2430_v11, %v793_v61  ;;  %v2093_v61 = vld [vmem:[%s2950_s7 + $0x28] sm:$0xff]  ;;  %v2384_v11 = vpack.c.bf16 %v2102_v10, %v2101_v9  ;;  %v1925_v10 = vld [vmem:[%s2962_s19] sm:$0xff] }
 0x386   : > { %v2375_v63 = vpack.c.bf16 %v2093_v61, %v2092_v60  ;;  %v1835_v60 = vld [vmem:[%s2960_s17 + $0x10] sm:$0xff]  ;;  %v1836_v61 = vld [vmem:[%s2960_s17 + $0x18] sm:$0xff] }
 0x387   : > { %v808_v17 = vmul.f32 %v2080_v12, %v801_v13 }
 0x389   : > { %v2718_v19 = vadd.f32 %v2081_v16, %v808_v17  ;;  %v2097_v16 = vld [vmem:[%s2951_s8 + $0x1] ss:$0 sm:$0xff] }
 0x38a   : > { %v2104_v17 = vld [vmem:[%s2953_s10 + $0x1] ss:$0 sm:$0xff] }
 0x38b   : > { %2199 = vmatmul.mubr.msk.f32.vlgmr.msra.gmra.mrb[0].mxu1 %vm827_vm3, %v2718_v19 }
 0x38c   : > { %2364 = vmatpush3.bf16.msra.mxu1 %v2363_v18  ;;  %2209 = vmatprep.mubr.msk.f32.mxu1 %vm2454_vm2, %v2455_v7 }
 0x38d   : > { %2365 = vmatprep.subr.bf16.mxu1 %v2453_v3 }
 0x390   : > { %2367 = vmatpush3.bf16.msra.mxu1 %v2366_v22 }
 0x391   : > { %2368 = vmatprep.subr.bf16.mxu1 %v2453_v3 }
 0x393   : > { %2210 = vmatmul.mubr.msk.f32.vlgmr.msra.gmra.mrb[2].mxu1 %vm827_vm3, %v2718_v19 }
 0x394   : > { %2370 = vmatpush3.bf16.msra.mxu1 %v2369_v25  ;;  %2220 = vmatprep.mubr.msk.f32.mxu1 %vm2454_vm2, %v2455_v7 }
 0x395   : > { %2371 = vmatprep.subr.bf16.mxu1 %v2453_v3 }
 0x398   : > { %2373 = vmatpush3.bf16.msra.mxu1 %v2372_v28 }
 0x399   : > { %2228 = vmatprep.subr.mxu1 %v2455_v7 }
 0x39b   : > { %2221 = vmatmul.mubr.msk.f32.vlgmr.msra.gmra.mrb[4].mxu1 %vm827_vm3, %v2718_v19 }
 0x39c   : > { %2230 = vmatprep.mubr.msk.f32.mxu1 %vm2454_vm2, %v2455_v7 }
 0x45e   : > { %v897_v29 = vpop.f32.mrb[0].mxu1 }
 0x45f   : > { %v2200_v30 = vpop.f32.mrb[1].mxu1  ;;  %v898_v33 = vadd.f32 %v2082_v31, %v897_v29 }
 0x461   : > { %v901_v40 = vmul.f32 0.25, %v898_v33  ;;  %v2117_v33 = vld [vmem:[%s2956_s13 + $0x10] sm:$0xff] }
 0x466   : > { %v979_v34 = vpop.f32.mrb[2].mxu1 }
 0x467   : > { %v980_v37 = vadd.f32 %v2084_v32, %v979_v34  ;;  %v2211_v38 = vpop.f32.mrb[3].mxu1  ;;  %v2118_v34 = vld [vmem:[%s2956_s13 + $0x18] sm:$0xff] }
 0x468   : > { %v2393_v35 = vpack.c.bf16 %v2118_v34, %v2117_v33  ;;  %v1232_v38 = vld [vmem:[%s2956_s13 + $0x8] sm:$0xff] }
 0x469   : > { %2224 = vmatpush3.xpose.msk.msra.mxu0 %vm1064_vm4, %v980_v37  ;;  %v1231_v37 = vld [vmem:[%s2956_s13] sm:$0xff] }
 0x46a   : > { %2386 = vmatprep.subr.bf16.mxu0 %v2453_v3 }
 0x46c   : > { %2226 = vmatmul.mubr.msk.f32.vlgmr.msra.gmra.mrb[2].mxu0 %vm1064_vm4, %v901_v40  ;;  %v2396_v40 = vpack.c.bf16 %v1232_v38, %v1231_v37 }
 0x46d   : > { %2388 = vmatpush3.bf16.msra.mxu0 %v2387_v39  ;;  %2263 = vmatprep.mubr.msk.f32.mxu0 %vm2454_vm2, %v2455_v7 }
 0x46e   : > { %v1060_v45 = vpop.f32.mrb[4].mxu1  ;;  %2389 = vmatprep.subr.bf16.mxu0 %v2453_v3 }
 0x46f   : > { %v1061_v46 = vadd.f32 %v2086_v43, %v1060_v45  ;;  %v2222_v47 = vpop.f32.mrb[5].mxu1 }
 0x471   : > { %2229 = vmatpush3.msk.msra.mxu1 %vm1157_vm5, %v1061_v46  ;;  %2391 = vmatpush3.bf16.msra.mxu0 %v2390_v44 }
 0x472   : > { %2374 = vmatprep.subr.bf16.mxu1 %v2453_v3  ;;  %2392 = vmatprep.subr.bf16.mxu0 %v2453_v3 }
 0x474   : > { %2264 = vmatmul.mubr.msk.f32.vlgmr.msra.gmra.mrb[4].mxu0 %vm827_vm3, %v2718_v19 }
 0x475   : > { %2280 = vmatprep.mubr.msk.f32.mxu0 %vm2454_vm2, %v2455_v7  ;;  %2394 = vmatpush3.bf16.msra.mxu0 %v2393_v35 }
 0x476   : > { %2398 = vmatprep.subr.bf16.mxu0 %v2453_v3 }
 0x53f   : > { %v1137_v48 = vpop.f32.mrb[2].mxu0 }
 0x540   : > { %v2227_v49 = vpop.f32.mrb[3].mxu0  ;;  %v1142_v50 = vsel %vm1141_vm6, %v1137_v48, -inf }
 0x541   : > { %1143 = vmax.xlane.f32.xlu0 %v1142_v50  ;;  %v2121_v49 = vld [vmem:[%s2957_s14] ss:$0 sm:$0xff] }
 0x547   : > { %v1479_v51 = vpop.f32.mrb[4].mxu0 }
 0x548   : > { %v2265_v52 = vpop.f32.mrb[5].mxu0 }
 0x5ce   : > { %v1144_v53 = vpop.xlane.xlu0 %1143 }
 0x5cf   : > { %v1145_v54 = vsub.f32 %v1137_v48, %v1144_v53 }
 0x5d1   : > { %v1146_v55 = vmul.f32 1.442695, %v1145_v54 }
 0x5d3   : > { %2431 = vpow2.f32 %v1146_v55 }
 0x5dd   : > { %v2432_v56 = vpop.eup %2431 }
 0x5de   : > { %v1148_v58 = vsel %vm1141_vm6, %v2432_v56, 0.0 }
 0x5df   : > { %1149 = vadd.xlane.f32.xlu1 %v1148_v58  ;;  %v1833_v58 = vld [vmem:[%s2960_s17] sm:$0xff] }
 0x66c   : > { %v1150_v59 = vpop.xlane.xlu1 %1149 }
 0x66d   : > { %2433 = vrcp.f32 %v1150_v59 }
 0x677   : > { %v2434_v62 = vpop.eup %2433 }
 0x678   : > { %v1152_v0 = vmul.f32 %v2434_v62, %v2432_v56  ;;  %v2402_v62 = vpack.c.bf16 %v1836_v61, %v1835_v60 }
 0x67a   : > { %2231 = vmatmul.mubr.msk.f32.vlgmr.msra.gmra.mrb[6].mxu1 %vm1153_vm7, %v1152_v0 }
 0x67b   : > { %2376 = vmatpush3.bf16.msra.mxu1 %v2375_v63  ;;  %2241 = vmatprep.mubr.msk.f32.mxu1 %vm2454_vm2, %v2455_v7 }
 0x67c   : > { %2377 = vmatprep.subr.bf16.mxu1 %v2453_v3 }
 0x67f   : > { %2379 = vmatpush3.bf16.msra.mxu1 %v2378_v4  ;;  %v2122_v4 = vld [vmem:[%s2958_s15] ss:$0 sm:$0xff] }
 0x680   : > { %2380 = vmatprep.subr.bf16.mxu1 %v2453_v3 }
 0x682   : > { %2242 = vmatmul.mubr.msk.f32.vlgmr.msra.gmra.mrb[8].mxu1 %vm827_vm3, %v2718_v19 }
 0x683   : > { %2382 = vmatpush3.bf16.msra.mxu1 %v2381_v8  ;;  %2252 = vmatprep.mubr.msk.f32.mxu1 %vm2454_vm2, %v2455_v7 }
 0x684   : > { %2383 = vmatprep.subr.bf16.mxu1 %v2453_v3 }
 0x687   : > { %2385 = vmatpush3.bf16.msra.mxu1 %v2384_v11  ;;  %v1926_v11 = vld [vmem:[%s2962_s19 + $0x8] sm:$0xff] }
 0x688   : > { %2266 = vmatprep.subr.mxu1 %v2455_v7 }
 0x68a   : > { %2253 = vmatmul.mubr.msk.f32.vlgmr.msra.gmra.mrb[10].mxu1 %vm827_vm3, %v2718_v19  ;;  %v2111_v19 = vld [vmem:[%s2955_s12 + $0x1] ss:$0 sm:$0xff] }
 0x68b   : > { %2268 = vmatprep.mubr.msk.f32.mxu1 %vm2454_vm2, %v2455_v7  ;;  %v1480_v24 = vadd.f32 %v2111_v19, %v1479_v51  ;;  %v2124_v19 = vld [vmem:[%s2961_s18] ss:$0 sm:$0xff] }
 0x74d   : > { %v1227_v12 = vpop.f32.mrb[6].mxu1 }
 0x74e   : > { %v2232_v13 = vpop.f32.mrb[7].mxu1 }
 0x74f   : > { %v1927_v13 = vld [vmem:[%s2962_s19 + $0x10] sm:$0xff] }
 0x755   : > { %v1312_v14 = vpop.f32.mrb[8].mxu1 }
 0x756   : > { %v2243_v15 = vpop.f32.mrb[9].mxu1  ;;  %v1313_v18 = vadd.f32 %v2097_v16, %v1312_v14  ;;  %v1928_v14 = vld [vmem:[%s2962_s19 + $0x18] sm:$0xff]  ;;  %v1929_v16 = vld [vmem:[%s2962_s19 + $0x20] sm:$0xff] }
 0x757   : > { %v2408_v15 = vpack.c.bf16 %v1928_v14, %v1927_v13 }
 0x758   : > { %v1316_v23 = vmul.f32 0.25, %v1313_v18 }
 0x75d   : > { %v1396_v20 = vpop.f32.mrb[10].mxu1 }
 0x75e   : > { %v1397_v21 = vadd.f32 %v2104_v17, %v1396_v20  ;;  %v2254_v22 = vpop.f32.mrb[11].mxu1  ;;  %v1930_v17 = vld [vmem:[%s2962_s19 + $0x28] sm:$0xff]  ;;  %v1931_v20 = vld [vmem:[%s2962_s19 + $0x30] sm:$0xff] }
 0x75f   : > { %v2411_v18 = vpack.c.bf16 %v1930_v17, %v1929_v16 }
 0x760   : > { %2267 = vmatpush3.xpose.msk.msra.mxu1 %vm1064_vm4, %v1397_v21  ;;  %v1932_v21 = vld [vmem:[%s2962_s19 + $0x38] sm:$0xff] }
 0x761   : > { %2271 = vmatprep.subr.mxu1 %v2455_v7  ;;  %v2414_v22 = vpack.c.bf16 %v1932_v21, %v1931_v20 }
 0x763   : > { %2269 = vmatmul.mubr.msk.f32.vlgmr.msra.gmra.mrb[12].mxu1 %vm1064_vm4, %v1316_v23 }
 0x764   : > { %2272 = vmatpush3.msk.msra.mxu1 %vm1157_vm5, %v1480_v24  ;;  %2273 = vmatprep.mubr.msk.f32.mxu1 %vm2454_vm2, %v2455_v7 }
 0x765   : > { %2395 = vmatprep.subr.bf16.mxu1 %v2453_v3 }
 0x836   : > { %v1555_v25 = vpop.f32.mrb[12].mxu1 }
 0x837   : > { %v2270_v26 = vpop.f32.mrb[13].mxu1  ;;  %v1559_v27 = vsel %vm1141_vm6, %v1555_v25, -inf }
 0x838   : > { %1560 = vmax.xlane.f32.xlu0 %v1559_v27 }
 0x8c5   : > { %v1561_v28 = vpop.xlane.xlu0 %1560 }
 0x8c6   : > { %v1562_v29 = vsub.f32 %v1555_v25, %v1561_v28 }
 0x8c8   : > { %v1563_v30 = vmul.f32 1.442695, %v1562_v29 }
 0x8ca   : > { %2435 = vpow2.f32 %v1563_v30 }
 0x8d4   : > { %v2436_v31 = vpop.eup %2435 }
 0x8d5   : > { %v1565_v32 = vsel %vm1141_vm6, %v2436_v31, 0.0 }
 0x8d6   : > { %1566 = vadd.xlane.f32.xlu1 %v1565_v32  ;;  %v2128_v32 = vld [vmem:[%s2963_s20] ss:$0 sm:$0xff] }
 0x963   : > { %v1567_v36 = vpop.xlane.xlu1 %1566 }
 0x964   : > { %2437 = vrcp.f32 %v1567_v36 }
 0x96e   : > { %v2438_v39 = vpop.eup %2437 }
 0x96f   : > { %v1569_v41 = vmul.f32 %v2438_v39, %v2436_v31 }
 0x971   : > { %2274 = vmatmul.mubr.msk.f32.vlgmr.msra.gmra.mrb[14].mxu1 %vm1153_vm7, %v1569_v41 }
 0x972   : > { %2397 = vmatpush3.bf16.msra.mxu1 %v2396_v40  ;;  %2287 = vmatprep.mubr.msk.f32.mxu1 %vm2454_vm2, %v2455_v7 }
 0x973   : > { %2404 = vmatprep.subr.bf16.mxu1 %v2453_v3 }
 0x975   : > { %2288 = vmatmul.mubr.msk.f32.vlgmr.msra.gmra.mrb[16].mxu1 %vm1064_vm4, %v1227_v12  ;;  %v2405_v12 = vpack.c.bf16 %v1926_v11, %v1925_v10 }
 0x976   : > { %2317 = vmatprep.mubr.msk.f32.mxu1 %vm2454_vm2, %v2455_v7 }
 0x977   : > { %2406 = vmatpush3.bf16.msra.mxu1 %v2405_v12 }
 0x978   : > { %2407 = vmatprep.subr.bf16.mxu1 %v2453_v3 }
 0x97b   : > { %2409 = vmatpush3.bf16.msra.mxu1 %v2408_v15 }
 0x97c   : > { %2410 = vmatprep.subr.bf16.mxu1 %v2453_v3 }
 0x97f   : > { %2412 = vmatpush3.bf16.msra.mxu1 %v2411_v18 }
 0x980   : > { %2413 = vmatprep.subr.bf16.mxu1 %v2453_v3 }
 0x983   : > { %2415 = vmatpush3.bf16.msra.mxu1 %v2414_v22 }
 0xa44   : > { %v1642_v42 = vpop.f32.mrb[14].mxu1 }
 0xa45   : > { %v2275_v43 = vpop.f32.mrb[15].mxu1  ;;  %2281 = vmatmul.mubr.msk.f32.vlgmr.msra.gmra.mrb[6].mxu0 %vm1064_vm4, %v1642_v42 }
 0xa46   : > { %2298 = vmatprep.mubr.msk.f32.mxu0 %vm2454_vm2, %v2455_v7 }
 0xa48   : > { %v1791_v44 = vpop.f32.mrb[16].mxu1 }
 0xa49   : > { %v2289_v45 = vpop.f32.mrb[17].mxu1 }
 0xb18   : > { %v1718_v46 = vpop.f32.mrb[6].mxu0 }
 0xb19   : > { %v1792_v47 = vadd.f32 %v1791_v44, %v1718_v46  ;;  %v2282_v48 = vpop.f32.mrb[7].mxu0 }
 0xb1b   : > { %v1795_v50 = vadd.f32 %v1792_v47, %v2681_v57  ;;  %v1834_v57 = vld [vmem:[%s2960_s17 + $0x8] sm:$0xff] }
 0xb1c   : > { %v2399_v59 = vpack.c.bf16 %v1834_v57, %v1833_v58 }
 0xb1d   : > { %v2874_v51 = vadd.f32 %v2121_v49, %v1795_v50 }
 0xb1e   : > { %2400 = vmatpush3.bf16.msra.mxu0 %v2399_v59 }
 0xb1f   : > { %v1806_v52 = vsel %vm758_vm1, %v2874_v51, 0.0  ;;  %2401 = vmatprep.subr.bf16.mxu0 %v2453_v3 }
 0xb20   : > { %1807 = vadd.xlane.f32.xlu0 %v1806_v52 }
 0xb22   : > { %2403 = vmatpush3.bf16.msra.mxu0 %v2402_v62 }
 0xbad   : > { %v1808_v53 = vpop.xlane.xlu0 %1807 }
 0xbae   : > { %v1809_v54 = vmul.f32 0.03125, %v1808_v53 }
 0xbb0   : > { %v1810_v7 = vsub.f32 %v2874_v51, %v1809_v54 }
 0xbb2   : > { %v1811_v55 = vmul.f32 %v1810_v7, %v1810_v7 }
 0xbb4   : > { %v1812_v56 = vsel %vm758_vm1, %v1811_v55, 0.0 }
 0xbb5   : > { %1813 = vadd.xlane.f32.xlu1 %v1812_v56 }
 0xc42   : > { %v1814_v63 = vpop.xlane.xlu1 %1813 }
 0xc43   : > { %v1815_v0 = vmul.f32 0.03125, %v1814_v63 }
 0xc45   : > { %v1816_v1 = vadd.f32 1e-05, %v1815_v0 }
 0xc47   : > { %2439 = vrsqrt.f32 %v1816_v1 }
 0xc51   : > { %v2440_v2 = vpop.eup %2439 }
 0xc52   : > { %v1818_v5 = vmul.f32 %v2440_v2, %v1810_v7 }
 0xc54   : > { %v1825_v8 = vmul.f32 %v2122_v4, %v1818_v5 }
 0xc56   : > { %v1832_v9 = vadd.f32 %v2123_v6, %v1825_v8 }
 0xc58   : > { %2299 = vmatmul.mubr.msk.f32.vlgmr.msra.gmra.mrb[8].mxu0 %vm827_vm3, %v1832_v9 }
 0xd2b   : > { %v1913_v23 = vpop.f32.mrb[8].mxu0 }
 0xd2c   : > { %v1914_v24 = vadd.f32 %v2124_v19, %v1913_v23  ;;  %v2300_v25 = vpop.f32.mrb[9].mxu0 }
 0xd2e   : > { %v2126_v26 = vmul.f32 -1.702, %v1914_v24 }
 0xd30   : > { %v1919_v3 = vmul.f32 1.442695, %v2126_v26 }
 0xd32   : > { %2441 = vpow2.f32 %v1919_v3 }
 0xd3c   : > { %v2442_v27 = vpop.eup %2441 }
 0xd3d   : > { %v1921_v28 = vadd.f32 1.0, %v2442_v27 }
 0xd3f   : > { %2443 = vrcp.f32 %v1921_v28 }
 0xd49   : > { %v2444_v29 = vpop.eup %2443 }
 0xd4a   : > { %v1924_v30 = vmul.f32 %v2444_v29, %v1914_v24 }
 0xd4c   : > { %2318 = vmatmul.mubr.msk.f32.vlgmr.msra.gmra.mrb[18].mxu1 %vm682_vm0, %v1924_v30 }
 0xe1f   : > { %v2002_v31 = vpop.f32.mrb[18].mxu1 }
 0xe20   : > { %v2006_v33 = vadd.f32 %v2002_v31, %v2874_v51  ;;  %v2319_v34 = vpop.f32.mrb[19].mxu1 }
 0xe22   : > { %v2014_v35 = vadd.f32 %v2128_v32, %v2006_v33 }
 0xe24   : > { %2015 = vst.msk [vmem:[%s654_s5] sm:$0x1f] %vm758_vm1, %v2014_v35 }
 0xe25 PF: > { %s31_s2 = sadd.s32 1, %s2451_s2  }
 0xe26   : > { %p28_p4 = scmp.ge.s32.totalorder %s31_s2, 4  }
 0xe28   :  { %30 = sbr.rel (!%p28_p4) target bundleno = 7 (0x7), region = 141 }

</bundles_post_ra>
